<compile_context>
chip_gen: v6e
topology: v6e:2x2x1
jax: 0.10.0
libtpu: 0.0.40
codegen_flags: <defaults>
</compile_context>

<pallas_src>
import math
import numpy as np

import jax
import jax.numpy as jnp
from jax.experimental import pallas as pl
from jax.experimental.pallas import tpu as pltpu


# Row indices into the consolidated per-layer [NUM_VEC, D] vector-parameter table.
(FF1_LG, FF1_LB, FF1_B2,
 MH_LG, MH_LB, MH_BQ, MH_BK, MH_BV, MH_BO,
 CV_LG, CV_LB, CV_BPV, CV_BPG, CV_BDW, CV_BP2,
 FF2_LG, FF2_LB, FF2_B2,
 FIN_LG, FIN_LB) = range(20)
NUM_VEC = 20

_PARAM_ORDER = ("vecD", "bff", "wD", "wFF", "wdw")


# ----------------------------------------------------------------------------
# Frontend: stride-2 frame stacking (host reshape) + Linear projection as a
# row-tiled, lane-dense Pallas matmul.
# TODO(synk): the real frontend is cfg.frontend() (e.g. VGG); this is a stand-in.
# ----------------------------------------------------------------------------
def frontend_apply(x_flat, w, b):
    M, Kin = x_flat.shape
    D = w.shape[1]
    TM = min(256, ((M + 7) // 8) * 8)
    Mp = pl.cdiv(M, TM) * TM
    if Mp != M:
        x_flat = jnp.pad(x_flat, ((0, Mp - M), (0, 0)))
    wb = w.astype(jnp.bfloat16)

    def kern(x_ref, w_ref, b_ref, o_ref):
        o_ref[...] = (
            jnp.dot(x_ref[...].astype(jnp.bfloat16), w_ref[...],
                    preferred_element_type=jnp.float32)
            + b_ref[...])

    out = pl.pallas_call(
        kern,
        out_shape=jax.ShapeDtypeStruct((Mp, D), jnp.float32),
        grid=(Mp // TM,),
        in_specs=[
            pl.BlockSpec((TM, Kin), lambda i: (i, 0)),
            pl.BlockSpec((Kin, D), lambda i: (0, 0)),
            pl.BlockSpec((1, D), lambda i: (0, 0)),
        ],
        out_specs=pl.BlockSpec((TM, D), lambda i: (i, 0)),
        compiler_params=pltpu.CompilerParams(
            dimension_semantics=("parallel",)),
    )(x_flat, wb, b)
    return out[:M]


# ----------------------------------------------------------------------------
# Fused multi-layer conformer kernel: grid point (bt, l) runs layer l on a
# batch tile of Bt sequences.  Activations + attention bias live in VMEM
# scratch across the whole layer loop.
# ----------------------------------------------------------------------------
def make_encoder_kernel(Bt, T, D, FF, H, K, L):
    dh = D // H
    pad = (K - 1) // 2
    R = Bt * T                           # stacked rows per batch tile
    f32 = jnp.float32
    bf16 = jnp.bfloat16

    # lane offsets inside the packed [D, 2FF+7D] weight slab (all mult. of 128)
    OFF_FF1A = 0
    OFF_FF2A = FF
    OFF_QKV = 2 * FF                      # width 3D (q|k|v, head-major lanes)
    OFF_PW = 2 * FF + 3 * D               # width 2D (GLU value | gate)
    OFF_WO = 2 * FF + 5 * D               # width D
    OFF_WP2 = 2 * FF + 6 * D              # width D

    def kernel(x_ref, mq_ref, kg_ref, qc_ref, kc_ref,
               vecD_ref, bff_ref, wD_ref, wFF_ref, wdw_ref,
               o_ref, act_ref, bias_ref):
        l = pl.program_id(1)

        @pl.when(l == 0)
        def _():
            # load the batch tile's activations once
            act_ref[...] = x_ref[...].reshape(R, D)
            # rebuild the chunk attention bias from O(T) descriptors, once per
            # batch tile, cache across layers.  Reproduces create_chunk_mask
            # exactly: allowed(q,k) = chunk(k) <= chunk(q) AND trailing-lookahead
            # column AND key not padded.  (True == allowed; the i6 block inverts
            # the mask before torch MHA, we apply it as an additive -inf bias.)
            qc = qc_ref[...]               # [T, 1] chunk id per query
            kc = kc_ref[...]               # [1, T] chunk id per key
            kg = kg_ref[...]               # [Bt, 1, T] key valid AND lookahead col
            allow = jnp.logical_and((kc <= qc)[None, :, :], kg > 0.5)
            bias_ref[...] = jnp.where(allow, 0.0, -1e30).astype(f32)

        vec = vecD_ref[0]                  # [NUM_VEC, D] f32
        bff = bff_ref[0]                   # [2, FF]      f32
        wD = wD_ref[0]                     # [D, 2FF+7D]  bf16
        wFF = wFF_ref[0]                   # [FF, 2D]     bf16
        wdw = wdw_ref[0]                   # [K, D]       f32 (BN-folded taps)

        def row(i):
            return vec[i:i + 1, :]         # [1, D]

        def ln(v, gi, bi):
            mu = jnp.mean(v, axis=-1, keepdims=True)
            var = jnp.mean(jnp.square(v - mu), axis=-1, keepdims=True)
            return (v - mu) * jax.lax.rsqrt(var + 1e-5) * row(gi) + row(bi)

        def silu(v):
            return v * jax.nn.sigmoid(v)

        def mm(a, w):                      # bf16 matmul, f32 accumulation
            return jnp.dot(a.astype(bf16), w, preferred_element_type=f32)

        def ff(v, lg, lb, w_in, b_hidden, w_out, b2i):
            hh = ln(v, lg, lb)
            hh = silu(mm(hh, w_in) + b_hidden)
            return mm(hh, w_out) + row(b2i)   # 0.5 half-step pre-folded on host

        x = act_ref[...]                   # [R, D] f32 layer input (row-stacked)
        mq = mq_ref[...].reshape(R, 1)     # [R, 1] 1.0 = valid frame

        # ---- FF1 (half-step folded into weights) ----
        x = ff(x, FF1_LG, FF1_LB, wD[:, OFF_FF1A:OFF_FF1A + FF], bff[0:1, :],
               wFF[:, 0:D], FF1_B2) + x

        # ---- MHSA: fused QKV projection on stacked rows, per-sequence scores ----
        y = ln(x, MH_LG, MH_LB)
        bqkv = jnp.concatenate([row(MH_BQ), row(MH_BK), row(MH_BV)], axis=1)
        qkv = mm(y, wD[:, OFF_QKV:OFF_QKV + 3 * D]) + bqkv      # [R, 3D], scale folded
        ctx_parts = []
        for b in range(Bt):                # static loop; attention is per-sequence
            sl = qkv[b * T:(b + 1) * T, :]                      # [T, 3D] f32

            def heads(off, sl=sl):
                return jnp.stack(
                    [sl[:, off + h * dh:off + (h + 1) * dh] for h in range(H)],
                    axis=0).astype(bf16)                        # [H, T, dh]

            qh, kh, vh = heads(0), heads(D), heads(2 * D)
            s = jnp.einsum("htd,hsd->hts", qh, kh,
                           preferred_element_type=f32)          # [H, T, T]
            s = s + bias_ref[b][None, :, :]
            s = s - jnp.max(s, axis=-1, keepdims=True)
            e = jnp.exp(s)
            p = e / jnp.sum(e, axis=-1, keepdims=True)          # exact softmax
            ctx = jnp.einsum("hts,hsd->htd", p.astype(bf16), vh,
                             preferred_element_type=f32)        # [H, T, dh]
            ctx_parts.append(
                jnp.concatenate([ctx[h] for h in range(H)], axis=1))  # [T, D]
        ctx_all = ctx_parts[0] if Bt == 1 else jnp.concatenate(ctx_parts, axis=0)
        att = mm(ctx_all, wD[:, OFF_WO:OFF_WO + D]) + row(MH_BO)
        x = att + x

        # ---- masked_fill(~sequence_mask, 0.0) (after the residual, as in ref) ----
        x = x * mq

        # ---- Convolution module ----
        y = ln(x, CV_LG, CV_LB)
        pw = mm(y, wD[:, OFF_PW:OFF_PW + 2 * D])                # [R, 2D] value|gate
        val = pw[:, 0:D] + row(CV_BPV)
        gate = pw[:, D:2 * D] + row(CV_BPG)
        y = val * jax.nn.sigmoid(gate)                          # GLU
        # depthwise conv along time: sublane rolls on the stacked rows + a
        # per-sequence boundary mask (rows from other sequences get masked out)
        t_idx = jax.lax.broadcasted_iota(jnp.int32, (Bt, T, 1), 1).reshape(R, 1)
        acc = jnp.zeros((R, D), f32)
        for kk in range(K):
            d = kk - pad
            shifted = y if d == 0 else pltpu.roll(y, (-d) % R, axis=0)
            valid = jnp.logical_and(t_idx + d >= 0, t_idx + d < T).astype(f32)
            acc = acc + shifted * valid * wdw[kk:kk + 1, :]
        y = acc + row(CV_BDW)              # eval BatchNorm folded into taps/bias
        y = silu(y)
        y = mm(y, wD[:, OFF_WP2:OFF_WP2 + D]) + row(CV_BP2)
        x = y + x

        # ---- FF2 (half-step folded into weights) ----
        x = ff(x, FF2_LG, FF2_LB, wD[:, OFF_FF2A:OFF_FF2A + FF], bff[1:2, :],
               wFF[:, D:2 * D], FF2_B2) + x

        # ---- final LayerNorm ----
        x = ln(x, FIN_LG, FIN_LB)

        act_ref[...] = x                   # carried to the next layer in VMEM

        @pl.when(l == L - 1)
        def _():
            o_ref[...] = x.reshape(Bt, T, D)

    return kernel


def choose_batch_tile(B, T, target_rows=256):
    """Largest divisor of B s.t. Bt*T <= target_rows (MXU row fill), but keep
    >= 2 parallel grid tiles when B >= 2 so both v7x TensorCores get work."""
    bt = 1
    for cand in range(1, B + 1):
        if B % cand == 0 and cand * T <= max(target_rows, T):
            bt = cand
    while bt > 1 and B // bt < 2:
        bt = max(c for c in range(1, bt) if B % c == 0)
    return bt


def conformer_blocks_apply(x, mq, kgate, qchunk, kchunk, params,
                           *, T, D, FF, H, K, L, Bt):
    B = x.shape[0]
    assert B % Bt == 0
    assert D % 128 == 0 and FF % 128 == 0 and T % 8 == 0
    NBT = B // Bt
    plist = [params[name] for name in _PARAM_ORDER]
    kernel = make_encoder_kernel(Bt, T, D, FF, H, K, L)

    def layer_spec(arr):
        nz = arr.ndim - 1
        return pl.BlockSpec((1,) + tuple(arr.shape[1:]),
                            lambda bt, l, nz=nz: (l,) + (0,) * nz)

    in_specs = [
        pl.BlockSpec((Bt, T, D), lambda bt, l: (bt, 0, 0)),
        pl.BlockSpec((Bt, T, 1), lambda bt, l: (bt, 0, 0)),
        pl.BlockSpec((Bt, 1, T), lambda bt, l: (bt, 0, 0)),
        pl.BlockSpec((T, 1), lambda bt, l: (0, 0)),
        pl.BlockSpec((1, T), lambda bt, l: (0, 0)),
    ] + [layer_spec(p) for p in plist]

    rows = B * T
    flops = 2 * rows * L * (4 * D * FF + 7 * D * D + 2 * T * D + K * D)
    transc = L * (rows * (2 * FF + 2 * D) + B * H * T * T)
    wbytes = sum(int(np.prod(p.shape)) * p.dtype.itemsize for p in plist)
    bytes_acc = int(NBT * wbytes + 2 * B * T * D * 4 + 2 * B * T * 4 + 2 * T * 4)
    cost = pl.CostEstimate(flops=int(flops), transcendentals=int(transc),
                           bytes_accessed=bytes_acc)

    return pl.pallas_call(
        kernel,
        out_shape=jax.ShapeDtypeStruct((B, T, D), jnp.float32),
        grid=(NBT, L),
        in_specs=in_specs,
        out_specs=pl.BlockSpec((Bt, T, D), lambda bt, l: (bt, 0, 0)),
        scratch_shapes=[pltpu.VMEM((Bt * T, D), jnp.float32),
                        pltpu.VMEM((Bt, T, T), jnp.float32)],
        compiler_params=pltpu.CompilerParams(
            dimension_semantics=("parallel", "arbitrary"),
            # <= 48 MiB keeps headroom on v7x's 64 MiB VMEM; v5e/v6e have 128 MiB.
            vmem_limit_bytes=48 * 1024 * 1024),
        cost_estimate=cost,
    )(x, mq, kgate, qchunk, kchunk, *plist)


# ----------------------------------------------------------------------------
# O(T) descriptors reproducing ConformerEncoderCOV1.create_chunk_mask exactly
# (True == attention allowed; the block inverts before torch MHA, here applied
# as an additive -inf bias inside the kernel).
# ----------------------------------------------------------------------------
def chunk_mask_descriptors(T, chunk_ext, lookahead):
    idx = np.arange(T)
    chunk_id = (idx // chunk_ext).astype(np.float32)
    if lookahead > 0:
        # mirrors attn_mask[:, :, :-lookahead] = False in the reference: only
        # the trailing `lookahead` columns of every chunk-ext block stay attendable
        look = ((idx % chunk_ext) >= (chunk_ext - lookahead)).astype(np.float32)
    else:
        look = np.ones((T,), np.float32)
    qc = jnp.asarray(chunk_id.reshape(T, 1))
    kc = jnp.asarray(chunk_id.reshape(1, T))
    kl = jnp.asarray(look.reshape(1, T))
    return qc, kc, kl


# ----------------------------------------------------------------------------
# Full encoder forward (chunked path of ConformerEncoderCOV1.forward).
# ----------------------------------------------------------------------------
def conformer_encoder_forward(data, seq_mask, wf, bf, params, lookahead_size,
                              *, D, FF, H, K, L):
    B, N, C_raw, F = data.shape
    C = C_raw // 2                             # stride-2 subsampling
    x = frontend_apply(data.reshape(B * N * C, 2 * F), wf, bf)
    x = x.reshape(B, N, C, D)
    m = seq_mask.reshape(B, N, C_raw)[:, :, ::2]

    # add_lookahead: borrow the first R subsampled frames of the next chunk
    # (zeros / False for the last chunk).
    # TODO(synk): add_lookahead is not shown in the reference; this is the
    # standard streaming-conformer implementation.
    R = lookahead_size
    if R > 0:
        fut_x = jnp.concatenate([x[:, 1:, :R], jnp.zeros_like(x[:, :1, :R])], axis=1)
        fut_m = jnp.concatenate([m[:, 1:, :R], jnp.zeros_like(m[:, :1, :R])], axis=1)
        x = jnp.concatenate([x, fut_x], axis=2)
        m = jnp.concatenate([m, fut_m], axis=2)

    Cp = C + R
    T = N * Cp
    xf = x.reshape(B, T, D)
    mf = m.reshape(B, T).astype(jnp.float32)

    qc, kc, kl = chunk_mask_descriptors(T, Cp, R)
    mq = mf[:, :, None]                        # [B, T, 1] query / masked_fill mask
    kgate = mf[:, None, :] * kl                # [B, 1, T] key valid & lookahead col

    Bt = choose_batch_tile(B, T)
    xf = conformer_blocks_apply(xf, mq, kgate, qc, kc, params,
                                T=T, D=D, FF=FF, H=H, K=K, L=L, Bt=Bt)

    x = xf.reshape(B, N, Cp, D)
    if R > 0:
        x = x[:, :, :-R]
        m = m[:, :, :-R]
    return x, m


# ----------------------------------------------------------------------------
# Deterministic synthetic parameters (eval-mode semantics), packed + host-folded:
#   * 1/sqrt(dh) folded into Wq / bq
#   * 0.5 half-step folded into FF output weights / biases
#   * eval BatchNorm (gamma, beta, running stats) folded into depthwise taps / bias
# ----------------------------------------------------------------------------
def init_params(key, L, D, FF, H, K):
    dh = D // H
    scale = 1.0 / math.sqrt(dh)
    layer_keys = jax.random.split(key, L)

    def dense(k, din, dout):
        s = 1.0 / math.sqrt(din)
        return jax.random.uniform(k, (din, dout), jnp.float32, -s, s)

    ones = jnp.ones((D,), jnp.float32)
    zeros = jnp.zeros((D,), jnp.float32)
    vecD_l, bff_l, wD_l, wFF_l, wdw_l = [], [], [], [], []
    for li in range(L):
        ks = jax.random.split(layer_keys[li], 16)
        # eval-mode BatchNorm with non-trivial running statistics
        gamma = 1.0 + 0.1 * jax.random.normal(ks[10], (D,), jnp.float32)
        beta = 0.1 * jax.random.normal(ks[11], (D,), jnp.float32)
        r_mean = 0.05 * jax.random.normal(ks[14], (D,), jnp.float32)
        r_var = 1.0 + 0.1 * jax.random.uniform(ks[15], (D,), jnp.float32)
        bn_s = gamma * jax.lax.rsqrt(r_var + 1e-5)
        bn_b = beta - r_mean * bn_s

        wff1a = dense(ks[0], D, FF)
        wff1b = 0.5 * dense(ks[1], FF, D)          # 0.5 half-step folded
        wff2a = dense(ks[12], D, FF)
        wff2b = 0.5 * dense(ks[13], FF, D)
        wq = scale * dense(ks[2], D, D)            # 1/sqrt(dh) folded (head-major lanes)
        wk = dense(ks[3], D, D)
        wv = dense(ks[4], D, D)
        wo = dense(ks[5], D, D)
        wpv = dense(ks[6], D, D)
        wpg = dense(ks[7], D, D)
        wp2 = dense(ks[9], D, D)
        wdw_raw = 0.1 * jax.random.normal(ks[8], (K, D), jnp.float32)
        b_dw = jnp.zeros((D,), jnp.float32)
        wdw_eff = wdw_raw * bn_s[None, :]          # BN scale folded into taps
        bdw_eff = b_dw * bn_s + bn_b               # BN shift folded into conv bias

        vecD_l.append(jnp.stack([
            ones, zeros, 0.5 * zeros,              # FF1: ln_g, ln_b, 0.5*b2
            ones, zeros, scale * zeros, zeros, zeros, zeros,  # MHSA: ln_g, ln_b, bq*scale, bk, bv, bo
            ones, zeros, zeros, zeros,             # Conv: ln_g, ln_b, b_pv, b_pg
            bdw_eff, zeros,                        # Conv: BN-folded dw bias, b_p2
            ones, zeros, 0.5 * zeros,              # FF2: ln_g, ln_b, 0.5*b2
            ones, zeros,                           # final LN: g, b
        ], axis=0))
        bff_l.append(jnp.zeros((2, FF), jnp.float32))
        wD_l.append(jnp.concatenate(
            [wff1a, wff2a, wq, wk, wv, wpv, wpg, wo, wp2],
            axis=1).astype(jnp.bfloat16))          # [D, 2FF+7D]
        wFF_l.append(jnp.concatenate([wff1b, wff2b], axis=1).astype(jnp.bfloat16))
        wdw_l.append(wdw_eff)

    return {"vecD": jnp.stack(vecD_l), "bff": jnp.stack(bff_l),
            "wD": jnp.stack(wD_l), "wFF": jnp.stack(wFF_l),
            "wdw": jnp.stack(wdw_l)}


if __name__ == "__main__":
    key = jax.random.PRNGKey(0)

    # B batches, N chunks, C_raw raw frames/chunk, F input features
    B, N, C_raw, F = 2, 3, 12, 16
    D, FF, H, K = 128, 512, 4, 7     # model dim, FF dim, heads, conv kernel size
    R = 2                            # post-frontend lookahead frames
    L = 2                            # number of conformer blocks

    k_data, k_front, k_par = jax.random.split(key, 3)
    data = jax.random.normal(k_data, (B, N, C_raw, F), jnp.float32)
    seq_mask = jnp.ones((B, N, C_raw), dtype=bool)
    seq_mask = seq_mask.at[1, N - 1, C_raw - 4:].set(False)   # some padded frames

    s = 1.0 / math.sqrt(2 * F)
    wf = jax.random.uniform(k_front, (2 * F, D), jnp.float32, -s, s)
    bfr = jnp.zeros((1, D), jnp.float32)
    params = init_params(k_par, L, D, FF, H, K)

    out, out_mask = conformer_encoder_forward(
        data, seq_mask, wf, bfr, params, R, D=D, FF=FF, H=H, K=K, L=L)
    jax.block_until_ready(out)

    assert out.shape == (B, N, C_raw // 2, D)
    assert out_mask.shape == (B, N, C_raw // 2)
    assert bool(jnp.isfinite(out).all())
    print("KERNEL_OK")
</pallas_src>

<mosaic_0001>
module attributes {stable_mosaic.version = 11 : i64} {
  func.func @kern(%arg0: i32, %arg1: memref<40x32xf32, #tpu.memory_space<vmem>>, %arg2: memref<32x128xbf16, #tpu.memory_space<vmem>>, %arg3: memref<1x128xf32, #tpu.memory_space<vmem>>, %arg4: memref<40x128xf32, #tpu.memory_space<vmem>>) attributes {dimension_semantics = [#tpu.dimension_semantics<parallel>], iteration_bounds = array<i64: 1>, scalar_prefetch = 0 : i64, scratch_operands = 0 : i64, tpu.core_type = #tpu.core_type<tc>, window_params = [{transform_indices = @transform_0, window_bounds = array<i64: 40, 32>}, {pipeline_mode = #tpu.pipeline_mode<synchronous>, transform_indices = @transform_1, window_bounds = array<i64: 32, 128>}, {pipeline_mode = #tpu.pipeline_mode<synchronous>, transform_indices = @transform_2, window_bounds = array<i64: 1, 128>}, {transform_indices = @transform_3, window_bounds = array<i64: 40, 128>}]} {
    %c0 = arith.constant 0 : index
    %c0_0 = arith.constant 0 : index
    %0 = vector.load %arg1[%c0, %c0_0] : memref<40x32xf32, #tpu.memory_space<vmem>>, vector<40x32xf32>
    %1 = arith.truncf %0 : vector<40x32xf32> to vector<40x32xbf16>
    %c0_1 = arith.constant 0 : index
    %c0_2 = arith.constant 0 : index
    %2 = vector.load %arg2[%c0_1, %c0_2] : memref<32x128xbf16, #tpu.memory_space<vmem>>, vector<32x128xbf16>
    %cst = arith.constant dense<0.000000e+00> : vector<40x128xf32>
    %3 = tpu.matmul %1, %2, %cst {dimension_numbers = #tpu.dot_dimension_numbers<[1], [0], [0], [1], [0, 0, 1, 1], [], []>} : vector<40x32xbf16>, vector<32x128xbf16>, vector<40x128xf32> -> vector<40x128xf32>
    %c0_3 = arith.constant 0 : index
    %c0_4 = arith.constant 0 : index
    %4 = vector.load %arg3[%c0_3, %c0_4] : memref<1x128xf32, #tpu.memory_space<vmem>>, vector<1x128xf32>
    %5 = vector.broadcast %4 : vector<1x128xf32> to vector<40x128xf32>
    %6 = arith.addf %3, %5 : vector<40x128xf32>
    %c0_5 = arith.constant 0 : index
    %c0_6 = arith.constant 0 : index
    %7 = vector.load %arg4[%c0_5, %c0_6] : memref<40x128xf32, #tpu.memory_space<vmem>>, vector<40x128xf32>
    tpu.vector_store %arg4[%c0_5, %c0_6], %6 {strides = array<i32>} : memref<40x128xf32, #tpu.memory_space<vmem>>, vector<40x128xf32>,
    return
  }
  func.func @transform_0(%arg0: i32) -> (i32, i32) {
    %c0_i32 = arith.constant 0 : i32
    %c0_i32_0 = arith.constant 0 : i32
    return %arg0, %c0_i32 : i32, i32
  }
  func.func @transform_1(%arg0: i32) -> (i32, i32) {
    %c0_i32 = arith.constant 0 : i32
    %c0_i32_0 = arith.constant 0 : i32
    %c0_i32_1 = arith.constant 0 : i32
    return %c0_i32, %c0_i32_0 : i32, i32
  }
  func.func @transform_2(%arg0: i32) -> (i32, i32) {
    %c0_i32 = arith.constant 0 : i32
    %c0_i32_0 = arith.constant 0 : i32
    %c0_i32_1 = arith.constant 0 : i32
    return %c0_i32, %c0_i32_0 : i32, i32
  }
  func.func @transform_3(%arg0: i32) -> (i32, i32) {
    %c0_i32 = arith.constant 0 : i32
    %c0_i32_0 = arith.constant 0 : i32
    return %arg0, %c0_i32 : i32, i32
  }
}

</mosaic_0001>

<bundles_post_ra>
// kernel: tpu_custom_call.1
= control target key start
LH: loop header
LB: loop body
LE: loop exit
PB: predicated region body
PF: predicated region fallthrough
CT: control target
= control target key end

     0   :  { %v194_v1 = vmov 0.0   ;;  %vm195_vm0 = vmmov 0   ;;  %s246_s0 = inlined_call_operand.vmem [shape: f32[40,32], index: 0, kind: input, shape index: {}]   ;;  %s247_s1 = inlined_call_operand.vmem [shape: bf16[32,128], index: 1, kind: input, shape index: {}]   ;;  %s248_s2 = inlined_call_operand.vmem [shape: f32[1,128], index: 2, kind: input, shape index: {}]   ;;  %s249_s3 = inlined_call_operand.hbm [shape: f32[40,128], index: 3, kind: output, shape index: {}]  }
   0x1   :  { %v170_v0 = vld [vmem:[%s247_s1 + $0x8] sm:$0xff]   ;;  %145 = vmatprep.subr.bf16.mxu0 %v194_v1  ;;  %161 = vmatprep.subr.bf16.mxu1 %v194_v1  ;;  %v171_v2 = vld [vmem:[%s247_s1] sm:$0xff]   ;;  %v18_v5 = vld [vmem:[%s246_s0 + $0x10] sm:$0xff] }
   0x2   :  { %146 = vmatpush3.bf16.msra.mxu0 %v170_v0  ;;  %163 = vmatpush3.bf16.msra.mxu1 %v170_v0  ;;  %v16_v3 = vld [vmem:[%s246_s0] sm:$0xff]  ;;  %v17_v4 = vld [vmem:[%s246_s0 + $0x8] sm:$0xff]  ;;  %v19_v6 = vld [vmem:[%s246_s0 + $0x18] sm:$0xff] }
   0x3   :  { %147 = vmatprep.subr.bf16.mxu0 %v194_v1  ;;  %162 = vmatprep.subr.bf16.mxu1 %v194_v1 }
   0x4   :  { %149 = vmatprep.mubr.msk.bf16.mxu0 %vm195_vm0, %v194_v1  ;;  %153 = vmatprep.mubr.msk.bf16.mxu1 %vm195_vm0, %v194_v1 }
   0x5   :  { %8 = vsyncpa [#allocation3], 0  ;;  %v21_v7 = vpack.c.bf16 %v17_v4, %v16_v3  ;;  %v22_v8 = vpack.c.bf16 %v19_v6, %v18_v5  ;;  %vm47_vm1 = vcmask 261120   ;;  %v20_v9 = vld [vmem:[%s246_s0 + $0x20] sm:$0xff]  ;;  %s196_s27 = smov [#allocation2]  }
   0x6   :  { %148 = vmatpush3.bf16.msra.mxu0 %v171_v2  ;;  %164 = vmatpush3.bf16.msra.mxu1 %v171_v2  ;;  %v23_v10 = vpack.c.bf16 %v20_v9, %v20_v9  ;;  %v134_v11 = vld [vmem:[%s248_s2] ss:$0 sm:$0xff]  ;;  %s123_s0 = sshll.u32 %s196_s27, 4  ;;  %s124_s0 = int_to_ptr.vmem [resolvable:$true] %s123_s0 }
   0x7   :  { %s172_s2 = scalar_lea.vmem %s124_s0, 640  ;;  %p177_p1 = scmp.lt.s32.totalorder %s124_s0, %s124_s0 }
   0x8   :  { %p173_p0 = scmp.ne.s32.totalorder %s124_s0, %s172_s2  ;;  %p178_p2 = scmp.lt.s32.totalorder %s172_s2, %s172_s2 }
   0x9   :  { %150 = vmatmul.mubr.msk.bf16.vlgmr.msra.gmra.mxu0 %vm47_vm1, %v21_v7  ;;  %154 = vmatmul.mubr.msk.bf16.vlgmr.msra.gmra.mxu1 %vm47_vm1, %v22_v8 }
   0xa   :  { %157 = vmatprep.mubr.msk.bf16.mxu1 %vm195_vm0, %v194_v1  ;;  %p179_p3 = por %p178_p2, %p177_p1 }
   0xc   :  { %p180_p4 = pnand %p179_p3, %p173_p0 }
  0x11   :  { %158 = vmatmul.mubr.msk.bf16.gmra.mxu1 %vm47_vm1, %v23_v10 }
  0xc9   :  { %v91_v12 = vpop.f32.mrf.mxu0  ;;  %v99_v13 = vpop.f32.mrf.mxu1 }
  0xca   :  { %v92_v14 = vadd.f32 %v134_v11, %v91_v12  ;;  %v100_v15 = vadd.f32 %v134_v11, %v99_v13 }
  0xcb   :  { %v151_v16 = vpop.f32.mrf.mxu0  ;;  %v155_v17 = vpop.f32.mrf.mxu1 }
  0xcc   :  { %113 = vst [vmem:[#allocation2] sm:$0xff] %v92_v14  ;;  %115 = vst [vmem:[#allocation2 + $0x10] sm:$0xff] %v100_v15 }
  0xcd   :  { %v94_v18 = vpop.f32.mrf.mxu0  ;;  %v102_v19 = vpop.f32.mrf.mxu1 }
  0xce   :  { %v95_v20 = vadd.f32 %v134_v11, %v94_v18  ;;  %v103_v21 = vadd.f32 %v134_v11, %v102_v19 }
  0xcf   :  { %v152_v22 = vpop.f32.mrf.mxu0  ;;  %v156_v23 = vpop.f32.mrf.mxu1 }
  0xd0   :  { %114 = vst [vmem:[#allocation2 + $0x8] sm:$0xff] %v95_v20  ;;  %116 = vst [vmem:[#allocation2 + $0x18] sm:$0xff] %v103_v21 }
  0xd1   :  { %v107_v24 = vpop.f32.mrf.mxu1 }
  0xd2   :  { %v108_v25 = vadd.f32 %v134_v11, %v107_v24 }
  0xd3   :  { %v159_v26 = vpop.f32.mrf.mxu1 }
  0xd4   :  { %117 = vst [vmem:[#allocation2 + $0x20] sm:$0xff] %v108_v25 }
  0xd5   :  { %v110_v27 = vpop.f32.mrf.mxu1 }
  0xd6   :  { %183 = shalt.err (!%p180_p4)
}
  0xd7   :  { %s197_s28 = smov 128   ;;  %s198_s29 = smov 8   ;;  %v160_v28 = vpop.f32.mrf.mxu1 }
  0xd8   :  { %129 = dma.vmem_to_hbm [thread:$0]  %s124_s0, 640, %s249_s3, [#allocation3], %s197_s28, %s197_s28, %s198_s29  }
  0xd9   :  { %192 = dma.done.wait [#allocation3], 640  }
  0xda   :  { %193 = vsyncadd [#allocation3], 4294966656 }
  0xdb   :  { %133 = vsyncpa [#allocation3], 1 }

</bundles_post_ra>
